<compile_context>
chip_gen: v7x
topology: tpu7x:2x2x1
jax: 0.10.0
libtpu: 0.0.40
codegen_flags: <defaults>
</compile_context>

<pallas_src>
import functools

import numpy as np
import jax
import jax.numpy as jnp
from jax.experimental import pallas as pl
from jax.experimental.pallas import tpu as pltpu


# ------------------------------ fused forward kernel ------------------------------
def _fused_repr_kernel(x_ref, waug_ref, pk_ref, out_ref):
    # Per-grid-step blocks (Bs = batches handled by this step):
    #   x_ref    (Bs, N*Ct+1, HW)   clamped/masked images, spatially flattened,
    #                               with a trailing ones row (carries the bias)
    #   waug_ref (Bs, N*R, N*Ct+1)  block-diag per-observation 1x1-conv weight,
    #                               pose-projection+bias folded into last column
    #   pk_ref   (HW, S*S)          Kronecker one-hot nearest-neighbor resize
    #   out_ref  (Bs, R, S*S)       aggregated representation (lane-dense S*S)
    Bs, R, _ = out_ref.shape
    N = waug_ref.shape[1] // R
    inv_n = 1.0 / N

    for lb in range(Bs):  # static unroll, Bs <= 2
        # --- per-observation 1x1-conv repr + folded pose/bias at H*W resolution ---
        rep = jnp.dot(waug_ref[lb], x_ref[lb],
                      preferred_element_type=jnp.float32)            # (N*R, HW)
        rep = jnp.maximum(rep, 0.0)                                   # ReLU

        # --- aggregate: mean over the N observations (sublane-aligned slices) ---
        acc = rep[0:R, :]
        for n in range(1, N):                                         # N is small
            acc = acc + rep[n * R:(n + 1) * R, :]
        acc = acc * inv_n                                              # (R, HW)

        # --- nearest-neighbor resize LAST (pk is a pure column selection, so it
        #     commutes exactly with bias/ReLU/mean); lane-dense (R, S*S) store ---
        out_ref[lb] = jnp.dot(acc, pk_ref[...],
                              preferred_element_type=jnp.float32
                              ).astype(out_ref.dtype)


# ----------------------------------- wrapper -----------------------------------
def _nearest_kron_onehot(size, h, w):
    # PyTorch F.interpolate(mode='nearest'): src = floor(dst * in/out).
    def onehot(out_size, in_size):
        idx = np.floor(np.arange(out_size) * (in_size / out_size)).astype(np.int64)
        idx = np.clip(idx, 0, in_size - 1)
        m = np.zeros((out_size, in_size), np.float32)
        m[np.arange(out_size), idx] = 1.0
        return m
    ph = onehot(size, h)                              # (S, H)
    pw = onehot(size, w)                              # (S, W)
    return np.ascontiguousarray(np.kron(ph, pw).T)    # (H*W, S*S)


def _tensorcores_per_chip():
    """TensorCores exposed per JAX device: 2 on megacore chips (v7x/v5p/v4/v3),
    1 on v5e/v6e. Safe fallback = 1 (never more grid steps than cores)."""
    try:
        kind = jax.devices()[0].device_kind.lower()
    except Exception:
        return 1
    if any(t in kind for t in ("v7", "v5p", "v4", "v3")):
        return 2
    return 1


@functools.partial(jax.jit, static_argnames=("size", "grid_steps"))
def fused_representation(ind, mir, rgh, poses, wxT, wpT, bT, *, size, grid_steps=1):
    """clamp/mask + 1x1-conv repr + pose/bias + ReLU + mean over N + nearest resize."""
    B, N, Ci, H, W = ind.shape
    Cm, Cr = mir.shape[2], rgh.shape[2]
    assert Cr == 1, "roughness mask expects a single channel"
    Ct = Ci + Cm + Cr
    R = wxT.shape[0]
    HW, S2 = H * W, size * size
    G = grid_steps
    assert B % G == 0, "grid_steps must divide the batch size"
    Bs = B // G

    # create_observation_tensor prep (clamp / roughness mask / concat) done here so
    # XLA fuses it and the kernel gets ONE pre-masked image ref instead of four.
    ind_c = jnp.clip(ind, 0.0, 1e25)
    mir_m = jnp.where(rgh > 0.75, 0.0, mir)
    x = jnp.concatenate([
        ind_c.reshape(B, N * Ci, HW),
        mir_m.reshape(B, N * Cm, HW),
        rgh.reshape(B, N * Cr, HW),
        jnp.ones((B, 1, HW), ind.dtype),        # ones row: carries the folded bias
    ], axis=1)                                  # (B, N*Ct + 1, HW)

    # Block-diagonal per-observation 1x1-conv weight, matching the pass-major /
    # observation-minor row order of x; pose projection + bias folded into the
    # last column (pairs with the ones row of x).
    eye = jnp.eye(N, dtype=wxT.dtype)
    wbig = jnp.concatenate([
        jnp.kron(eye, wxT[:, :Ci]),
        jnp.kron(eye, wxT[:, Ci:Ci + Cm]),
        jnp.kron(eye, wxT[:, Ci + Cm:]),
    ], axis=1)                                                        # (N*R, N*Ct)
    pose_bias = (jnp.einsum("bnp,rp->bnr", poses, wpT)
                 + bT[:, 0][None, None, :]).reshape(B, N * R, 1)      # (B, N*R, 1)
    waug = jnp.concatenate(
        [jnp.broadcast_to(wbig[None], (B, N * R, N * Ct)), pose_bias],
        axis=2)                                                       # (B, N*R, N*Ct+1)

    pk = jnp.asarray(_nearest_kron_onehot(size, H, W))                # (HW, S*S)

    out = pl.pallas_call(
        _fused_repr_kernel,
        out_shape=jax.ShapeDtypeStruct((B, R, S2), ind.dtype),
        grid_spec=pltpu.PrefetchScalarGridSpec(
            num_scalar_prefetch=0,
            grid=(G,),
            in_specs=[
                pl.BlockSpec((Bs, N * Ct + 1, HW), lambda g: (g, 0, 0)),
                pl.BlockSpec((Bs, N * R, N * Ct + 1), lambda g: (g, 0, 0)),
                pl.BlockSpec((HW, S2), lambda g: (0, 0)),   # grid-invariant
            ],
            out_specs=pl.BlockSpec((Bs, R, S2), lambda g: (g, 0, 0)),
        ),
        compiler_params=pltpu.CompilerParams(dimension_semantics=("parallel",)),
    )(x, waug, pk)
    return out.reshape(B, R, size, size)


# --------------------------------- handler (glue) ---------------------------------
class RepresentationHandler:
    """Pallas stand-in for the PyTorch RepresentationHandler forward pass.

    TODO(synk): TowerNet / PyramidNet internals and their aggregate()/r_loss are not
    defined in the provided source; the representation is a deterministic pointwise
    (1x1 conv) net with pose broadcast, ReLU, and mean aggregation over observations.
    """

    def __init__(self, sizes, passes_list, detach, in_channels, pose_dim, repr_dim, key):
        self.sizes = sizes
        self.passes = passes_list
        self.detach = detach
        self._tc = _tensorcores_per_chip()
        self.params = []
        for _ in sizes:
            k1, k2, k3, key = jax.random.split(key, 4)
            wxT = 0.1 * jax.random.normal(k1, (repr_dim, in_channels), jnp.float32)
            wpT = 0.1 * jax.random.normal(k2, (repr_dim, pose_dim), jnp.float32)
            bT = 0.1 * jax.random.normal(k3, (repr_dim, 1), jnp.float32)
            self.params.append((wxT, wpT, bT))

    def forward(self, observation_passes, query_passes, observation_poses, query_poses, factor):
        # query_passes / query_poses / factor are unused by the representation forward,
        # exactly as in the PyTorch module.
        outputs = []
        metrics = {}
        loss = jnp.float32(0.0)   # r_loss is empty for the stand-in representation
        B = observation_passes["indirect"].shape[0]
        grid_steps = min(B, self._tc)
        if B % grid_steps != 0:
            grid_steps = 1
        for i in range(len(self.params)):
            assert list(self.passes[i]) == ["indirect", "mirror", "roughness"]
            wxT, wpT, bT = self.params[i]
            r = fused_representation(
                observation_passes["indirect"], observation_passes["mirror"],
                observation_passes["roughness"], observation_poses,
                wxT, wpT, bT, size=self.sizes[i], grid_steps=grid_steps)
            if self.detach[i]:
                r = jax.lax.stop_gradient(r)
            outputs.append(r)
        return outputs, metrics, loss


# ------------------------------- pure-JAX reference -------------------------------
def reference_forward(obs_passes, poses, size, params):
    wxT, wpT, bT = params
    ind = jnp.clip(obs_passes["indirect"], 0.0, 1e25)
    rgh = obs_passes["roughness"]
    mir = jnp.where(rgh > 0.75, jnp.zeros_like(obs_passes["mirror"]), obs_passes["mirror"])
    t = jnp.concatenate([ind, mir, rgh], axis=2)               # (B, N, Ct, H, W)
    B, N, C, H, W = t.shape
    idx_h = np.clip(np.floor(np.arange(size) * (H / size)).astype(np.int32), 0, H - 1)
    idx_w = np.clip(np.floor(np.arange(size) * (W / size)).astype(np.int32), 0, W - 1)
    t = jnp.take(t, jnp.asarray(idx_h), axis=3)
    t = jnp.take(t, jnp.asarray(idx_w), axis=4)                # (B, N, Ct, S, S)
    h = (jnp.einsum("rc,bncxy->bnrxy", wxT, t)
         + jnp.einsum("rp,bnp->bnr", wpT, poses)[:, :, :, None, None]
         + bT[None, None, :, :, None])
    h = jnp.maximum(h, 0.0)
    return jnp.mean(h, axis=1)                                 # (B, R, S, S)


if __name__ == "__main__":
    key = jax.random.PRNGKey(0)
    B, N, H, W = 2, 3, 8, 8
    S = 16          # render_size
    P = 7           # GQN pose dim
    R = 32          # representation channels

    k1, k2, k3, k4, key = jax.random.split(key, 5)
    observation_passes = {
        "indirect": jax.random.normal(k1, (B, N, 3, H, W), jnp.float32),
        "mirror": jax.random.normal(k2, (B, N, 3, H, W), jnp.float32),
        "roughness": jax.random.uniform(k3, (B, N, 1, H, W), jnp.float32),
    }
    observation_poses = jax.random.normal(k4, (B, N, P), jnp.float32)
    query_passes = {}     # unused in forward
    query_poses = None    # unused in forward
    factor = 1.0

    handler = RepresentationHandler(
        sizes=[S],
        passes_list=[["indirect", "mirror", "roughness"]],
        detach=[False],
        in_channels=3 + 3 + 1,
        pose_dim=P,
        repr_dim=R,
        key=key,
    )

    outputs, metrics, loss = handler.forward(
        observation_passes, query_passes, observation_poses, query_poses, factor)
    jax.block_until_ready(outputs)

    r_ref = reference_forward(observation_passes, observation_poses, S, handler.params[0])
    np.testing.assert_allclose(np.asarray(outputs[0]), np.asarray(r_ref),
                               rtol=5e-2, atol=5e-2)
    print("KERNEL_OK")
</pallas_src>

<mosaic_0001>
module attributes {stable_mosaic.version = 11 : i64} {
  func.func @_fused_repr_kernel(%arg0: i32, %arg1: memref<2x22x64xf32, #tpu.memory_space<vmem>>, %arg2: memref<2x96x22xf32, #tpu.memory_space<vmem>>, %arg3: memref<64x256xf32, #tpu.memory_space<vmem>>, %arg4: memref<2x32x256xf32, #tpu.memory_space<vmem>>) attributes {dimension_semantics = [#tpu.dimension_semantics<parallel>], iteration_bounds = array<i64: 1>, scalar_prefetch = 0 : i64, scratch_operands = 0 : i64, tpu.core_type = #tpu.core_type<tc>, window_params = [{transform_indices = @transform_0, window_bounds = array<i64: 2, 22, 64>}, {transform_indices = @transform_1, window_bounds = array<i64: 2, 96, 22>}, {pipeline_mode = #tpu.pipeline_mode<synchronous>, transform_indices = @transform_2, window_bounds = array<i64: 64, 256>}, {transform_indices = @transform_3, window_bounds = array<i64: 2, 32, 256>}]} {
    %c0 = arith.constant 0 : index
    %c0_0 = arith.constant 0 : index
    %c0_1 = arith.constant 0 : index
    %0 = vector.load %arg2[%c0, %c0_0, %c0_1] : memref<2x96x22xf32, #tpu.memory_space<vmem>>, vector<1x96x22xf32>
    %1 = vector.shape_cast %0 : vector<1x96x22xf32> to vector<96x22xf32>
    %c0_2 = arith.constant 0 : index
    %c0_3 = arith.constant 0 : index
    %c0_4 = arith.constant 0 : index
    %2 = vector.load %arg1[%c0_2, %c0_3, %c0_4] : memref<2x22x64xf32, #tpu.memory_space<vmem>>, vector<1x22x64xf32>
    %3 = vector.shape_cast %2 : vector<1x22x64xf32> to vector<22x64xf32>
    %cst = arith.constant dense<0.000000e+00> : vector<96x64xf32>
    %4 = tpu.matmul %1, %3, %cst {dimension_numbers = #tpu.dot_dimension_numbers<[1], [0], [0], [1], [0, 0, 1, 1], [], []>} : vector<96x22xf32>, vector<22x64xf32>, vector<96x64xf32> -> vector<96x64xf32>
    %cst_5 = arith.constant 0.000000e+00 : f32
    %5 = vector.broadcast %cst_5 : f32 to vector<96x64xf32>
    %6 = arith.maximumf %4, %5 : vector<96x64xf32>
    %7 = vector.extract_strided_slice %6 {offsets = [0, 0], sizes = [32, 64], strides = [1, 1]} : vector<96x64xf32> to vector<32x64xf32>
    %8 = vector.extract_strided_slice %6 {offsets = [32, 0], sizes = [32, 64], strides = [1, 1]} : vector<96x64xf32> to vector<32x64xf32>
    %9 = arith.addf %7, %8 : vector<32x64xf32>
    %10 = vector.extract_strided_slice %6 {offsets = [64, 0], sizes = [32, 64], strides = [1, 1]} : vector<96x64xf32> to vector<32x64xf32>
    %11 = arith.addf %9, %10 : vector<32x64xf32>
    %cst_6 = arith.constant 0.333333343 : f32
    %12 = vector.broadcast %cst_6 : f32 to vector<32x64xf32>
    %13 = arith.mulf %11, %12 : vector<32x64xf32>
    %c0_7 = arith.constant 0 : index
    %c0_8 = arith.constant 0 : index
    %14 = vector.load %arg3[%c0_7, %c0_8] : memref<64x256xf32, #tpu.memory_space<vmem>>, vector<64x256xf32>
    %cst_9 = arith.constant dense<0.000000e+00> : vector<32x256xf32>
    %15 = tpu.matmul %13, %14, %cst_9 {dimension_numbers = #tpu.dot_dimension_numbers<[1], [0], [0], [1], [0, 0, 1, 1], [], []>} : vector<32x64xf32>, vector<64x256xf32>, vector<32x256xf32> -> vector<32x256xf32>
    %c0_10 = arith.constant 0 : index
    %c0_11 = arith.constant 0 : index
    %c0_12 = arith.constant 0 : index
    %16 = vector.load %arg4[%c0_10, %c0_11, %c0_12] : memref<2x32x256xf32, #tpu.memory_space<vmem>>, vector<1x32x256xf32>
    %17 = vector.shape_cast %16 : vector<1x32x256xf32> to vector<32x256xf32>
    %18 = vector.shape_cast %15 : vector<32x256xf32> to vector<1x32x256xf32>
    tpu.vector_store %arg4[%c0_10, %c0_11, %c0_12], %18 {strides = array<i32>} : memref<2x32x256xf32, #tpu.memory_space<vmem>>, vector<1x32x256xf32>,
    %c1 = arith.constant 1 : index
    %c0_13 = arith.constant 0 : index
    %c0_14 = arith.constant 0 : index
    %19 = vector.load %arg2[%c1, %c0_13, %c0_14] : memref<2x96x22xf32, #tpu.memory_space<vmem>>, vector<1x96x22xf32>
    %20 = vector.shape_cast %19 : vector<1x96x22xf32> to vector<96x22xf32>
    %c1_15 = arith.constant 1 : index
    %c0_16 = arith.constant 0 : index
    %c0_17 = arith.constant 0 : index
    %21 = vector.load %arg1[%c1_15, %c0_16, %c0_17] : memref<2x22x64xf32, #tpu.memory_space<vmem>>, vector<1x22x64xf32>
    %22 = vector.shape_cast %21 : vector<1x22x64xf32> to vector<22x64xf32>
    %cst_18 = arith.constant dense<0.000000e+00> : vector<96x64xf32>
    %23 = tpu.matmul %20, %22, %cst_18 {dimension_numbers = #tpu.dot_dimension_numbers<[1], [0], [0], [1], [0, 0, 1, 1], [], []>} : vector<96x22xf32>, vector<22x64xf32>, vector<96x64xf32> -> vector<96x64xf32>
    %cst_19 = arith.constant 0.000000e+00 : f32
    %24 = vector.broadcast %cst_19 : f32 to vector<96x64xf32>
    %25 = arith.maximumf %23, %24 : vector<96x64xf32>
    %26 = vector.extract_strided_slice %25 {offsets = [0, 0], sizes = [32, 64], strides = [1, 1]} : vector<96x64xf32> to vector<32x64xf32>
    %27 = vector.extract_strided_slice %25 {offsets = [32, 0], sizes = [32, 64], strides = [1, 1]} : vector<96x64xf32> to vector<32x64xf32>
    %28 = arith.addf %26, %27 : vector<32x64xf32>
    %29 = vector.extract_strided_slice %25 {offsets = [64, 0], sizes = [32, 64], strides = [1, 1]} : vector<96x64xf32> to vector<32x64xf32>
    %30 = arith.addf %28, %29 : vector<32x64xf32>
    %cst_20 = arith.constant 0.333333343 : f32
    %31 = vector.broadcast %cst_20 : f32 to vector<32x64xf32>
    %32 = arith.mulf %30, %31 : vector<32x64xf32>
    %c0_21 = arith.constant 0 : index
    %c0_22 = arith.constant 0 : index
    %33 = vector.load %arg3[%c0_21, %c0_22] : memref<64x256xf32, #tpu.memory_space<vmem>>, vector<64x256xf32>
    %cst_23 = arith.constant dense<0.000000e+00> : vector<32x256xf32>
    %34 = tpu.matmul %32, %33, %cst_23 {dimension_numbers = #tpu.dot_dimension_numbers<[1], [0], [0], [1], [0, 0, 1, 1], [], []>} : vector<32x64xf32>, vector<64x256xf32>, vector<32x256xf32> -> vector<32x256xf32>
    %c1_24 = arith.constant 1 : index
    %c0_25 = arith.constant 0 : index
    %c0_26 = arith.constant 0 : index
    %35 = vector.load %arg4[%c1_24, %c0_25, %c0_26] : memref<2x32x256xf32, #tpu.memory_space<vmem>>, vector<1x32x256xf32>
    %36 = vector.shape_cast %35 : vector<1x32x256xf32> to vector<32x256xf32>
    %37 = vector.shape_cast %34 : vector<32x256xf32> to vector<1x32x256xf32>
    tpu.vector_store %arg4[%c1_24, %c0_25, %c0_26], %37 {strides = array<i32>} : memref<2x32x256xf32, #tpu.memory_space<vmem>>, vector<1x32x256xf32>,
    return
  }
  func.func @transform_0(%arg0: i32) -> (i32, i32, i32) {
    %c0_i32 = arith.constant 0 : i32
    %c0_i32_0 = arith.constant 0 : i32
    %c0_i32_1 = arith.constant 0 : i32
    return %arg0, %c0_i32, %c0_i32_0 : i32, i32, i32
  }
  func.func @transform_1(%arg0: i32) -> (i32, i32, i32) {
    %c0_i32 = arith.constant 0 : i32
    %c0_i32_0 = arith.constant 0 : i32
    %c0_i32_1 = arith.constant 0 : i32
    return %arg0, %c0_i32, %c0_i32_0 : i32, i32, i32
  }
  func.func @transform_2(%arg0: i32) -> (i32, i32) {
    %c0_i32 = arith.constant 0 : i32
    %c0_i32_0 = arith.constant 0 : i32
    %c0_i32_1 = arith.constant 0 : i32
    return %c0_i32, %c0_i32_0 : i32, i32
  }
  func.func @transform_3(%arg0: i32) -> (i32, i32, i32) {
    %c0_i32 = arith.constant 0 : i32
    %c0_i32_0 = arith.constant 0 : i32
    %c0_i32_1 = arith.constant 0 : i32
    return %arg0, %c0_i32, %c0_i32_0 : i32, i32, i32
  }
}

</mosaic_0001>

<bundles_post_ra>
// kernel: fused_representation.1
= control target key start
LH: loop header
LB: loop body
LE: loop exit
PB: predicated region body
PF: predicated region fallthrough
CT: control target
= control target key end

     0   :  { %vm29_vm0 = vcmask 179200   ;;  %vm66_vm1 = vcmask 1045504   ;;  %v856_v56 = vmov 0.0   ;;  %vm235_vm2 = vcmask 523264   ;;  %s1135_s0 = inlined_call_operand.vmem [shape: f32[2,22,64], index: 0, kind: input, shape index: {}]   ;;  %s1136_s1 = inlined_call_operand.vmem [shape: f32[2,96,22], index: 1, kind: input, shape index: {}]   ;;  %s1137_s2 = inlined_call_operand.vmem [shape: f32[64,256], index: 2, kind: input, shape index: {}]   ;;  %s1138_s3 = inlined_call_operand.vmem [shape: f32[2,32,256], index: 3, kind: output, shape index: {}]  }
   0x1   :  { %v26_v0 = vld [vmem:[%s1135_s0] sm:$0xff]  ;;  %v27_v1 = vld [vmem:[%s1135_s0 + $0x8] sm:$0xff]  ;;  %v28_v4 = vld [vmem:[%s1135_s0 + $0x10] sm:$0x3f]  ;;  %312 = vmatprep.mubr.f32.mxu1 %v856_v56 }
   0x2   :  { %v815_v2 = vpack.c.bf16 %v27_v1, %v26_v0  ;;  %v14_v3 = vld [vmem:[%s1136_s1] sm:$0xff]  ;;  %v709_v5 = vld [vmem:[%s1135_s0 + $0x18] sm:$0xff]  ;;  %v15_v8 = vld [vmem:[%s1136_s1 + $0x8] sm:$0xff] }
   0x3   :  { %773 = vmatprep.mubr.msk.f32.mxu0 %vm29_vm0, %v14_v3  ;;  %v710_v6 = vld [vmem:[%s1135_s0 + $0x20] sm:$0xff]  ;;  %v16_v9 = vld [vmem:[%s1136_s1 + $0x10] sm:$0xff]  ;;  %v711_v10 = vld [vmem:[%s1135_s0 + $0x28] sm:$0x3f] }
   0x4   :  { %816 = vmatprep.subr.bf16.mxu0 %v815_v2  ;;  %v835_v7 = vpack.c.bf16 %v710_v6, %v709_v5  ;;  %v17_v11 = vld [vmem:[%s1136_s1 + $0x18] sm:$0xff]  ;;  %v18_v12 = vld [vmem:[%s1136_s1 + $0x20] sm:$0xff]  ;;  %v19_v13 = vld [vmem:[%s1136_s1 + $0x28] sm:$0xff] }
   0x5   :  { %818 = vmatpush3.bf16.msra.mxu0 %v815_v2  ;;  %v20_v14 = vld [vmem:[%s1136_s1 + $0x30] sm:$0xff]  ;;  %v21_v15 = vld [vmem:[%s1136_s1 + $0x38] sm:$0xff]  ;;  %v22_v16 = vld [vmem:[%s1136_s1 + $0x40] sm:$0xff] }
   0x6   :  { %771 = vmatprep.subr.msk.mxu0 %vm66_vm1, %v28_v4  ;;  %v23_v17 = vld [vmem:[%s1136_s1 + $0x48] sm:$0xff]  ;;  %v24_v18 = vld [vmem:[%s1136_s1 + $0x50] sm:$0xff]  ;;  %v25_v19 = vld [vmem:[%s1136_s1 + $0x58] sm:$0xff] }
   0x7   :  { %v697_v20 = vld [vmem:[%s1136_s1 + $0x60] sm:$0xff]  ;;  %v698_v21 = vld [vmem:[%s1136_s1 + $0x68] sm:$0xff]  ;;  %v699_v22 = vld [vmem:[%s1136_s1 + $0x70] sm:$0xff] }
   0x8   :  { %v700_v23 = vld [vmem:[%s1136_s1 + $0x78] sm:$0xff]  ;;  %v701_v24 = vld [vmem:[%s1136_s1 + $0x80] sm:$0xff]  ;;  %v702_v25 = vld [vmem:[%s1136_s1 + $0x88] sm:$0xff] }
   0x9   :  { %772 = vmatpush3.msk.msra.mxu0 %vm66_vm1, %v28_v4  ;;  %v703_v26 = vld [vmem:[%s1136_s1 + $0x90] sm:$0xff]  ;;  %v704_v27 = vld [vmem:[%s1136_s1 + $0x98] sm:$0xff]  ;;  %v705_v28 = vld [vmem:[%s1136_s1 + $0xa0] sm:$0xff] }
   0xa   :  { %774 = vmatmul.mubr.msk.f32.vlgmr.msra.gmra.mrb[0].mxu0 %vm29_vm0, %v15_v8  ;;  %836 = vmatprep.subr.bf16.mxu0 %v835_v7  ;;  %v706_v29 = vld [vmem:[%s1136_s1 + $0xa8] sm:$0xff]  ;;  %v707_v30 = vld [vmem:[%s1136_s1 + $0xb0] sm:$0xff]  ;;  %v708_v31 = vld [vmem:[%s1136_s1 + $0xb8] sm:$0xff] }
   0xb   :  { %838 = vmatpush3.bf16.msra.mxu0 %v835_v7  ;;  %776 = vmatprep.mubr.msk.f32.mxu0 %vm29_vm0, %v16_v9  ;;  %v220_v32 = vld [vmem:[%s1137_s2 + $0x8] sm:$0xff]  ;;  %v222_v33 = vld [vmem:[%s1137_s2 + $0x18] sm:$0xff]  ;;  %v219_v35 = vld [vmem:[%s1137_s2] sm:$0xff] }
   0xc   :  { %795 = vmatprep.subr.msk.mxu0 %vm66_vm1, %v711_v10  ;;  %v819_v34 = vpack.c.bf16 %v222_v33, %v220_v32  ;;  %v221_v36 = vld [vmem:[%s1137_s2 + $0x10] sm:$0xff]  ;;  %v224_v38 = vld [vmem:[%s1137_s2 + $0x28] sm:$0xff]  ;;  %v226_v39 = vld [vmem:[%s1137_s2 + $0x38] sm:$0xff] }
   0xd   :  { %v1007_v37 = vpack.c.bf16 %v221_v36, %v219_v35  ;;  %v1016_v40 = vpack.c.bf16 %v226_v39, %v224_v38  ;;  %v223_v41 = vld [vmem:[%s1137_s2 + $0x20] sm:$0xff]  ;;  %v225_v42 = vld [vmem:[%s1137_s2 + $0x30] sm:$0xff]  ;;  %v228_v44 = vld [vmem:[%s1137_s2 + $0x48] sm:$0xff] }
   0xe   :  { %777 = vmatmul.mubr.msk.f32.gmra.mrb[2].mxu0 %vm29_vm0, %v17_v11  ;;  %820 = vmatprep.subr.bf16.mxu1 %v819_v34  ;;  %v1024_v43 = vpack.c.bf16 %v225_v42, %v223_v41  ;;  %v230_v45 = vld [vmem:[%s1137_s2 + $0x58] sm:$0xff]  ;;  %v227_v47 = vld [vmem:[%s1137_s2 + $0x40] sm:$0xff]  ;;  %v229_v48 = vld [vmem:[%s1137_s2 + $0x50] sm:$0xff] }
   0xf   :  { %779 = vmatprep.mubr.msk.f32.mxu0 %vm29_vm0, %v18_v12  ;;  %796 = vmatpush3.msk.msra.mxu0 %vm66_vm1, %v711_v10  ;;  %v1034_v46 = vpack.c.bf16 %v230_v45, %v228_v44  ;;  %v1042_v49 = vpack.c.bf16 %v229_v48, %v227_v47  ;;  %v232_v50 = vld [vmem:[%s1137_s2 + $0x68] sm:$0xff]  ;;  %v234_v51 = vld [vmem:[%s1137_s2 + $0x78] sm:$0xff]  ;;  %v231_v53 = vld [vmem:[%s1137_s2 + $0x60] sm:$0xff] }
  0x10   :  { %822 = vmatpush1.bf16.msra.mxu1 %v1007_v37  ;;  %v1052_v52 = vpack.c.bf16 %v234_v51, %v232_v50  ;;  %v233_v54 = vld [vmem:[%s1137_s2 + $0x70] sm:$0xff] }
  0x11   :  { %824 = vmatprep.subr.bf16.mxu1 %v1016_v40  ;;  %v1060_v55 = vpack.c.bf16 %v233_v54, %v231_v53 }
  0x12   :  { %780 = vmatmul.mubr.msk.f32.gmra.mrb[4].mxu0 %vm29_vm0, %v19_v13 }
  0x13   :  { %782 = vmatprep.mubr.msk.f32.mxu0 %vm29_vm0, %v20_v14 }
  0x14   :  { %826 = vmatpush1.bf16.msra.mxu1 %v1024_v43 }
  0x15   :  { %828 = vmatprep.subr.bf16.mxu1 %v1034_v46 }
  0x16   :  { %783 = vmatmul.mubr.msk.f32.gmra.mrb[6].mxu0 %vm29_vm0, %v21_v15 }
  0x17   :  { %785 = vmatprep.mubr.msk.f32.mxu0 %vm29_vm0, %v22_v16 }
  0x18   :  { %830 = vmatpush1.bf16.msra.mxu1 %v1042_v49 }
  0x19   :  { %832 = vmatprep.subr.bf16.mxu1 %v1052_v52 }
  0x1a   :  { %786 = vmatmul.mubr.msk.f32.gmra.mrb[8].mxu0 %vm29_vm0, %v23_v17 }
  0x1b   :  { %788 = vmatprep.mubr.msk.f32.mxu0 %vm29_vm0, %v24_v18 }
  0x1c   :  { %834 = vmatpush1.bf16.msra.mxu1 %v1060_v55 }
  0x1d   :  { %840 = vmatprep.subr.bf16.mxu1 %v819_v34 }
  0x1e   :  { %789 = vmatmul.mubr.msk.f32.gmra.mrb[10].mxu0 %vm29_vm0, %v25_v19 }
  0x1f   :  { %797 = vmatprep.mubr.msk.f32.mxu0 %vm29_vm0, %v697_v20 }
  0x22   :  { %798 = vmatmul.mubr.msk.f32.vlgmr.msra.gmra.mrb[12].mxu0 %vm29_vm0, %v698_v21 }
  0x23   :  { %800 = vmatprep.mubr.msk.f32.mxu0 %vm29_vm0, %v699_v22 }
  0x26   :  { %801 = vmatmul.mubr.msk.f32.gmra.mrb[14].mxu0 %vm29_vm0, %v700_v23 }
  0x27   :  { %803 = vmatprep.mubr.msk.f32.mxu0 %vm29_vm0, %v701_v24 }
  0x2a   :  { %804 = vmatmul.mubr.msk.f32.gmra.mrb[16].mxu0 %vm29_vm0, %v702_v25 }
  0x2b   :  { %806 = vmatprep.mubr.msk.f32.mxu0 %vm29_vm0, %v703_v26 }
  0x2e   :  { %807 = vmatmul.mubr.msk.f32.gmra.mrb[18].mxu0 %vm29_vm0, %v704_v27 }
  0x2f   :  { %809 = vmatprep.mubr.msk.f32.mxu0 %vm29_vm0, %v705_v28 }
  0x32   :  { %810 = vmatmul.mubr.msk.f32.gmra.mrb[20].mxu0 %vm29_vm0, %v706_v29 }
  0x33   :  { %812 = vmatprep.mubr.msk.f32.mxu0 %vm29_vm0, %v707_v30 }
  0x36   :  { %813 = vmatmul.mubr.msk.f32.gmra.mrb[22].mxu0 %vm29_vm0, %v708_v31 }
  0xdd   :  { %v775_v57 = vpop.f32.mrb[0].mxu0 }
  0xde   :  { %v136_v58 = vpop.f32.mrb[1].mxu0  ;;  %v196_v62 = vmax.f32 %v775_v57, 0.0 }
  0xdf   :  { %v195_v1 = vmax.f32 %v136_v58, 0.0 }
  0xe1   :  { %v778_v59 = vpop.f32.mrb[2].mxu0 }
  0xe2   :  { %v146_v60 = vpop.f32.mrb[3].mxu0  ;;  %v198_v6 = vmax.f32 %v778_v59, 0.0 }
  0xe3   :  { %v197_v9 = vmax.f32 %v146_v60, 0.0 }
  0xe5   :  { %v781_v61 = vpop.f32.mrb[4].mxu0 }
  0xe6   :  { %v200_v63 = vmax.f32 %v781_v61, 0.0  ;;  %v156_v0 = vpop.f32.mrb[5].mxu0 }
  0xe7   :  { %v199_v2 = vmax.f32 %v156_v0, 0.0 }
  0xe8   :  { %v208_v3 = vadd.f32 %v200_v63, %v196_v62 }
  0xe9   :  { %v207_v4 = vadd.f32 %v199_v2, %v195_v1  ;;  %v784_v5 = vpop.f32.mrb[6].mxu0 }
  0xea   :  { %v202_v7 = vmax.f32 %v784_v5, 0.0  ;;  %v166_v8 = vpop.f32.mrb[7].mxu0 }
  0xeb   :  { %v201_v10 = vmax.f32 %v166_v8, 0.0 }
  0xec   :  { %v210_v11 = vadd.f32 %v202_v7, %v198_v6 }
  0xed   :  { %v209_v12 = vadd.f32 %v201_v10, %v197_v9  ;;  %v787_v13 = vpop.f32.mrb[8].mxu0 }
  0xee   :  { %v204_v14 = vmax.f32 %v787_v13, 0.0  ;;  %v176_v15 = vpop.f32.mrb[9].mxu0 }
  0xef   :  { %v203_v16 = vmax.f32 %v176_v15, 0.0 }
  0xf0   :  { %v212_v17 = vadd.f32 %v208_v3, %v204_v14 }
  0xf1   :  { %v211_v18 = vadd.f32 %v207_v4, %v203_v16  ;;  %v790_v19 = vpop.f32.mrb[10].mxu0 }
  0xf2   :  { %v206_v20 = vmax.f32 %v790_v19, 0.0  ;;  %v186_v21 = vpop.f32.mrb[11].mxu0  ;;  %v216_v28 = vmul.f32 0.33333334, %v212_v17 }
  0xf3   :  { %v215_v22 = vmul.f32 0.33333334, %v211_v18  ;;  %v205_v23 = vmax.f32 %v186_v21, 0.0 }
  0xf4   :  { %v214_v24 = vadd.f32 %v210_v11, %v206_v20 }
  0xf5   :  { %v213_v25 = vadd.f32 %v209_v12, %v205_v23  ;;  %693 = vmatmul.mubr.msk.f32.vlgmr.msra.gmra.mrb[0].mxu1 %vm235_vm2, %v215_v22  ;;  %v799_v26 = vpop.f32.mrb[12].mxu0 }
  0xf6   :  { %v467_v27 = vpop.f32.mrb[13].mxu0  ;;  %318 = vmatprep.mubr.f32.mxu1 %v856_v56  ;;  %842 = vmatpush1.bf16.msra.mxu1 %v1007_v37  ;;  %v527_v33 = vmax.f32 %v799_v26, 0.0  ;;  %v218_v36 = vmul.f32 0.33333334, %v214_v24 }
  0xf7   :  { %844 = vmatprep.subr.bf16.mxu1 %v1016_v40  ;;  %v217_v31 = vmul.f32 0.33333334, %v213_v25  ;;  %v526_v37 = vmax.f32 %v467_v27, 0.0 }
  0xf9   :  { %694 = vmatmul.mubr.msk.f32.gmra.mrb[2].mxu1 %vm235_vm2, %v216_v28  ;;  %v802_v29 = vpop.f32.mrb[14].mxu0 }
  0xfa   :  { %v477_v30 = vpop.f32.mrb[15].mxu0  ;;  %324 = vmatprep.mubr.f32.mxu1 %v856_v56  ;;  %846 = vmatpush1.bf16.msra.mxu1 %v1024_v43  ;;  %v529_v42 = vmax.f32 %v802_v29, 0.0 }
  0xfb   :  { %848 = vmatprep.subr.bf16.mxu1 %v1034_v46  ;;  %v528_v45 = vmax.f32 %v477_v30, 0.0 }
  0xfd   :  { %695 = vmatmul.mubr.msk.f32.gmra.mrb[4].mxu1 %vm235_vm2, %v217_v31  ;;  %v805_v32 = vpop.f32.mrb[16].mxu0 }
  0xfe   :  { %v531_v34 = vmax.f32 %v805_v32, 0.0  ;;  %v487_v35 = vpop.f32.mrb[17].mxu0  ;;  %330 = vmatprep.mubr.f32.mxu1 %v856_v56  ;;  %850 = vmatpush1.bf16.msra.mxu1 %v1042_v49 }
  0xff   :  { %v530_v38 = vmax.f32 %v487_v35, 0.0  ;;  %852 = vmatprep.subr.bf16.mxu1 %v1052_v52 }
 0x100   :  { %v539_v39 = vadd.f32 %v531_v34, %v527_v33 }
 0x101   :  { %v538_v40 = vadd.f32 %v530_v38, %v526_v37  ;;  %696 = vmatmul.mubr.msk.f32.gmra.mrb[6].mxu1 %vm235_vm2, %v218_v36  ;;  %v808_v41 = vpop.f32.mrb[18].mxu0 }
 0x102   :  { %v533_v43 = vmax.f32 %v808_v41, 0.0  ;;  %v497_v44 = vpop.f32.mrb[19].mxu0  ;;  %854 = vmatpush1.bf16.msra.mxu1 %v1060_v55  ;;  %642 = vmatprep.mubr.f32.mxu1 %v856_v56 }
 0x103   :  { %v532_v46 = vmax.f32 %v497_v44, 0.0 }
 0x104   :  { %v541_v47 = vadd.f32 %v533_v43, %v529_v42 }
 0x105   :  { %v540_v48 = vadd.f32 %v532_v46, %v528_v45  ;;  %v811_v49 = vpop.f32.mrb[20].mxu0 }
 0x106   :  { %v535_v50 = vmax.f32 %v811_v49, 0.0  ;;  %v507_v51 = vpop.f32.mrb[21].mxu0 }
 0x107   :  { %v534_v52 = vmax.f32 %v507_v51, 0.0 }
 0x108   :  { %v543_v53 = vadd.f32 %v539_v39, %v535_v50 }
 0x109   :  { %v542_v54 = vadd.f32 %v538_v40, %v534_v52  ;;  %v814_v57 = vpop.f32.mrb[22].mxu0 }
 0x10a   :  { %v537_v58 = vmax.f32 %v814_v57, 0.0  ;;  %v517_v59 = vpop.f32.mrb[23].mxu0  ;;  %v547_v55 = vmul.f32 0.33333334, %v543_v53 }
 0x10b   :  { %v546_v60 = vmul.f32 0.33333334, %v542_v54  ;;  %v536_v61 = vmax.f32 %v517_v59, 0.0 }
 0x10c   :  { %v545_v62 = vadd.f32 %v541_v47, %v537_v58 }
 0x10d   :  { %v544_v63 = vadd.f32 %v540_v48, %v536_v61  ;;  %725 = vmatmul.mubr.msk.f32.vlgmr.msra.gmra.mrb[8].mxu1 %vm235_vm2, %v546_v60 }
 0x10e   :  { %648 = vmatprep.mubr.f32.mxu1 %v856_v56  ;;  %v549_v1 = vmul.f32 0.33333334, %v545_v62 }
 0x10f   :  { %v548_v0 = vmul.f32 0.33333334, %v544_v63 }
 0x111   :  { %726 = vmatmul.mubr.msk.f32.gmra.mrb[10].mxu1 %vm235_vm2, %v547_v55 }
 0x112   :  { %654 = vmatprep.mubr.f32.mxu1 %v856_v56 }
 0x115   :  { %727 = vmatmul.mubr.msk.f32.gmra.mrb[12].mxu1 %vm235_vm2, %v548_v0 }
 0x116   :  { %660 = vmatprep.mubr.f32.mxu1 %v856_v56 }
 0x119   :  { %728 = vmatmul.mubr.msk.f32.gmra.mrb[14].mxu1 %vm235_vm2, %v549_v1 }
 0x1c8   :  { %v314_v2 = vpop.f32.mrb[0].mxu1 }
 0x1c9   :  { %337 = vst [vmem:[%s1138_s3] sm:$0xff] %v314_v2  ;;  %v316_v3 = vpop.f32.mrb[1].mxu1 }
 0x1ca   :  { %338 = vst [vmem:[%s1138_s3 + $0x8] sm:$0xff] %v316_v3 }
 0x1cc   :  { %v320_v4 = vpop.f32.mrb[2].mxu1 }
 0x1cd   :  { %339 = vst [vmem:[%s1138_s3 + $0x10] sm:$0xff] %v320_v4  ;;  %v322_v5 = vpop.f32.mrb[3].mxu1 }
 0x1ce   :  { %340 = vst [vmem:[%s1138_s3 + $0x18] sm:$0xff] %v322_v5 }
 0x1d0   :  { %v326_v56 = vpop.f32.mrb[4].mxu1 }
 0x1d1   :  { %341 = vst [vmem:[%s1138_s3 + $0x20] sm:$0xff] %v326_v56  ;;  %v328_v6 = vpop.f32.mrb[5].mxu1 }
 0x1d2   :  { %342 = vst [vmem:[%s1138_s3 + $0x28] sm:$0xff] %v328_v6 }
 0x1d4   :  { %v332_v7 = vpop.f32.mrb[6].mxu1 }
 0x1d5   :  { %343 = vst [vmem:[%s1138_s3 + $0x30] sm:$0xff] %v332_v7  ;;  %v334_v8 = vpop.f32.mrb[7].mxu1 }
 0x1d6   :  { %344 = vst [vmem:[%s1138_s3 + $0x38] sm:$0xff] %v334_v8 }
 0x1e0   :  { %v644_v9 = vpop.f32.mrb[8].mxu1 }
 0x1e1   :  { %729 = vst [vmem:[%s1138_s3 + $0x40] sm:$0xff] %v644_v9  ;;  %v646_v10 = vpop.f32.mrb[9].mxu1 }
 0x1e2   :  { %730 = vst [vmem:[%s1138_s3 + $0x48] sm:$0xff] %v646_v10 }
 0x1e4   :  { %v650_v11 = vpop.f32.mrb[10].mxu1 }
 0x1e5   :  { %731 = vst [vmem:[%s1138_s3 + $0x50] sm:$0xff] %v650_v11  ;;  %v652_v12 = vpop.f32.mrb[11].mxu1 }
 0x1e6   :  { %732 = vst [vmem:[%s1138_s3 + $0x58] sm:$0xff] %v652_v12 }
 0x1e8   :  { %v656_v13 = vpop.f32.mrb[12].mxu1 }
 0x1e9   :  { %733 = vst [vmem:[%s1138_s3 + $0x60] sm:$0xff] %v656_v13  ;;  %v658_v14 = vpop.f32.mrb[13].mxu1 }
 0x1ea   :  { %734 = vst [vmem:[%s1138_s3 + $0x68] sm:$0xff] %v658_v14 }
 0x1ec   :  { %v662_v15 = vpop.f32.mrb[14].mxu1 }
 0x1ed   :  { %735 = vst [vmem:[%s1138_s3 + $0x70] sm:$0xff] %v662_v15  ;;  %v664_v16 = vpop.f32.mrb[15].mxu1 }
 0x1ee   :  { %736 = vst [vmem:[%s1138_s3 + $0x78] sm:$0xff] %v664_v16 }

</bundles_post_ra>
